<compile_context>
chip_gen: v7x
topology: tpu7x:2x2x1
jax: 0.10.0
libtpu: 0.0.40
codegen_flags: <defaults>
</compile_context>

<pallas_src>
import functools

import jax
import jax.numpy as jnp
from jax.experimental import pallas as pl
from jax.experimental.pallas import tpu as pltpu


def _round_up(x: int, m: int) -> int:
    return ((x + m - 1) // m) * m


def _fused_mlp_kernel(x_ref, w_hid_ref, b_hid_ref, w_out_ref, b_out_ref, o_ref,
                      *, num_hidden: int):
    """All MLP_Head layers fused on one VMEM-resident activation tile.

    x_ref     : (tile_m, F)      activation tile (F = round_up(input_channel, 128))
    w_hid_ref : (Lh, F, F)       hidden-layer weights (resident, single-buffered)
    b_hid_ref : (Lh, 1, F)       hidden-layer biases
    w_out_ref : (F, F_out)       final-layer weight (F_out = round_up(output_channel, 128))
    b_out_ref : (1, F_out)       final-layer bias
    o_ref     : (tile_m, F_out)  output tile
    """
    cdt = w_out_ref.dtype                 # matmul operand dtype (bf16 by default)
    h = x_ref[...].astype(cdt)
    for i in range(num_hidden):           # static -> fully unrolled
        acc = jnp.dot(h, w_hid_ref[i], preferred_element_type=jnp.float32)  # MXU, f32 acc
        h = jnp.maximum(acc + b_hid_ref[i].astype(jnp.float32), 0.0).astype(cdt)
    out = jnp.dot(h, w_out_ref[...], preferred_element_type=jnp.float32)
    out = out + b_out_ref[...].astype(jnp.float32)
    o_ref[...] = out.astype(o_ref.dtype)


def init_mlp_head_params(key, layers, input_channel, output_channel, dtype=jnp.float32):
    """PyTorch-style uniform(-1/sqrt(fan_in), 1/sqrt(fan_in)) init.
    Weights are stored already transposed to (in_features, out_features)."""
    params = []
    for i in range(layers):
        in_f = input_channel
        out_f = output_channel if i == layers - 1 else input_channel
        key, kw, kb = jax.random.split(key, 3)
        bound = 1.0 / jnp.sqrt(in_f)
        w = jax.random.uniform(kw, (in_f, out_f), dtype=dtype, minval=-bound, maxval=bound)
        b = jax.random.uniform(kb, (out_f,), dtype=dtype, minval=-bound, maxval=bound)
        params.append((w, b))
    return params


def pack_params(params, compute_dtype=jnp.bfloat16):
    """One-time setup: zero-pad feature dims to multiples of 128 (lane-dense), stack the hidden
    layers into (Lh, F, F)/(Lh, 1, F), and keep the final layer as a separate (F, F_out) weight
    so the last layer's padding only goes to round_up(output_channel, 128). Zero pads are
    mathematically inert through matmul + bias-add + ReLU."""
    # TODO(synk): optional fp8(e4m3) weight storage + per-channel scale epilogue for v7x.
    L = len(params)
    in_f = params[0][0].shape[0]
    out_f = params[-1][0].shape[1]
    F = _round_up(in_f, 128)
    F_out = _round_up(out_f, 128)

    if L > 1:
        w_hid = jnp.stack([jnp.pad(w, ((0, F - w.shape[0]), (0, F - w.shape[1])))
                           for (w, _) in params[:-1]])
        b_hid = jnp.stack([jnp.pad(b, (0, F - b.shape[0])).reshape(1, F)
                           for (_, b) in params[:-1]])
    else:
        # Dummies keep the kernel signature fixed; never read when num_hidden == 0.
        w_hid = jnp.zeros((1, F, F), jnp.float32)
        b_hid = jnp.zeros((1, 1, F), jnp.float32)

    w_last, b_last = params[-1]
    w_out = jnp.pad(w_last, ((0, F - w_last.shape[0]), (0, F_out - w_last.shape[1])))
    b_out = jnp.pad(b_last, (0, F_out - b_last.shape[0])).reshape(1, F_out)

    return {
        "w_hid": w_hid.astype(compute_dtype),
        "b_hid": b_hid.astype(compute_dtype),
        "w_out": w_out.astype(compute_dtype),
        "b_out": b_out.astype(compute_dtype),
        "num_hidden": L - 1,
        "output_channel": out_f,
    }


def mlp_head_forward(x, packed, *, tile_m=512):
    """Fused forward matching MLP_Head: (layers-1) x [Linear + ReLU] then final Linear."""
    w_hid, b_hid = packed["w_hid"], packed["b_hid"]
    w_out, b_out = packed["w_out"], packed["b_out"]
    num_hidden = packed["num_hidden"]
    output_channel = packed["output_channel"]
    Lh = w_hid.shape[0]
    F, F_out = w_out.shape
    M, K = x.shape

    # --- batch tiling --------------------------------------------------------------------
    tile_m = max(8, _round_up(min(tile_m, _round_up(M, 8)), 8))
    m_pad = _round_up(M, tile_m)
    if m_pad // tile_m < 2 and _round_up(M, 8) >= 16:
        # v7x megacore: make sure the "parallel" batch axis has >= 2 grid steps.
        tile_m = _round_up(pl.cdiv(m_pad, 2), 8)
        m_pad = _round_up(M, tile_m)
    grid = (m_pad // tile_m,)

    # Pad activations only when needed (jnp.pad is a full extra HBM round trip).
    x_in = x if (m_pad == M and F == K) else jnp.pad(x, ((0, m_pad - M), (0, F - K)))

    # --- VMEM budget ---------------------------------------------------------------------
    bw = jnp.dtype(w_out.dtype).itemsize
    bx = jnp.dtype(x.dtype).itemsize
    vmem_needed = (2 * tile_m * F * bx            # double-buffered input tiles
                   + 2 * tile_m * F_out * bx      # double-buffered output tiles
                   + Lh * F * (F + 1) * bw        # single-buffered hidden weights + biases
                   + (F + 1) * F_out * bw)        # single-buffered final weight + bias
    # TODO(synk): once Lh*F*F*bw alone exceeds ~1/3 of 64 MiB (v7x), switch to per-layer
    # K/N tiling (extra grid axis over F) instead of keeping the whole stack resident.
    vmem_limit = int(min(max(1.5 * vmem_needed + (2 << 20), 16 << 20), 64 << 20))

    out = pl.pallas_call(
        functools.partial(_fused_mlp_kernel, num_hidden=num_hidden),
        out_shape=jax.ShapeDtypeStruct((m_pad, F_out), x.dtype),
        grid_spec=pltpu.PrefetchScalarGridSpec(
            num_scalar_prefetch=0,
            grid=grid,
            in_specs=[
                pl.BlockSpec((tile_m, F), lambda i: (i, 0)),        # acts: tiled over batch
                # Constant-index resident operands: single-buffer them (VMEM halved).
                pl.BlockSpec((Lh, F, F), lambda i: (0, 0, 0), pipeline_mode=pl.Buffered(1)),
                pl.BlockSpec((Lh, 1, F), lambda i: (0, 0, 0), pipeline_mode=pl.Buffered(1)),
                pl.BlockSpec((F, F_out), lambda i: (0, 0), pipeline_mode=pl.Buffered(1)),
                pl.BlockSpec((1, F_out), lambda i: (0, 0), pipeline_mode=pl.Buffered(1)),
            ],
            out_specs=pl.BlockSpec((tile_m, F_out), lambda i: (i, 0)),
        ),
        compiler_params=pltpu.CompilerParams(
            dimension_semantics=("parallel",),    # batch axis -> megacore split on v7x
            vmem_limit_bytes=vmem_limit,
        ),
    )(x_in, w_hid, b_hid, w_out, b_out)

    if m_pad != M or F_out != output_channel:
        out = out[:M, :output_channel]
    return out


def mlp_head_reference(x, params):
    n = len(params)
    for i, (w, b) in enumerate(params):
        x = x @ w + b
        if i != n - 1:
            x = jnp.maximum(x, 0.0)
    return x


if __name__ == "__main__":
    layers = 3
    input_channel = 32
    output_channel = 16
    batch = 8

    key = jax.random.PRNGKey(0)
    key, kx = jax.random.split(key)
    x = jax.random.normal(kx, (batch, input_channel), dtype=jnp.float32)

    params = init_mlp_head_params(key, layers, input_channel, output_channel)
    ref = mlp_head_reference(x, params)

    # f32 weights end-to-end (tight tolerance).
    packed_f32 = pack_params(params, compute_dtype=jnp.float32)
    out_f32 = jax.block_until_ready(mlp_head_forward(x, packed_f32))
    assert out_f32.shape == (batch, output_channel)
    assert jnp.allclose(out_f32, ref, atol=1e-5, rtol=1e-5)

    # Default: bf16 weight storage, bf16 activations between layers, f32 MXU accumulate.
    # (Activation precision is also bf16 between layers -- intentional; looser tolerance.)
    packed_bf16 = pack_params(params)
    out_bf16 = jax.block_until_ready(mlp_head_forward(x, packed_bf16))
    assert out_bf16.shape == (batch, output_channel)
    assert jnp.allclose(out_bf16, ref, atol=5e-2, rtol=5e-2)

    print("KERNEL_OK")
</pallas_src>

<mosaic_0001>
module attributes {stable_mosaic.version = 11 : i64} {
  func.func @_fused_mlp_kernel(%arg0: i32, %arg1: memref<8x128xf32, #tpu.memory_space<vmem>>, %arg2: memref<2x128x128xf32, #tpu.memory_space<vmem>>, %arg3: memref<2x1x128xf32, #tpu.memory_space<vmem>>, %arg4: memref<128x128xf32, #tpu.memory_space<vmem>>, %arg5: memref<1x128xf32, #tpu.memory_space<vmem>>, %arg6: memref<8x128xf32, #tpu.memory_space<vmem>>) attributes {dimension_semantics = [#tpu.dimension_semantics<parallel>], iteration_bounds = array<i64: 1>, scalar_prefetch = 0 : i64, scratch_operands = 0 : i64, tpu.core_type = #tpu.core_type<tc>, window_params = [{transform_indices = @transform_0, window_bounds = array<i64: 8, 128>}, {pipeline_mode = #tpu.pipeline_mode<synchronous>, transform_indices = @transform_1, window_bounds = array<i64: 2, 128, 128>}, {pipeline_mode = #tpu.pipeline_mode<synchronous>, transform_indices = @transform_2, window_bounds = array<i64: 2, 1, 128>}, {pipeline_mode = #tpu.pipeline_mode<synchronous>, transform_indices = @transform_3, window_bounds = array<i64: 128, 128>}, {pipeline_mode = #tpu.pipeline_mode<synchronous>, transform_indices = @transform_4, window_bounds = array<i64: 1, 128>}, {transform_indices = @transform_5, window_bounds = array<i64: 8, 128>}]} {
    %c0 = arith.constant 0 : index
    %c0_0 = arith.constant 0 : index
    %0 = vector.load %arg1[%c0, %c0_0] : memref<8x128xf32, #tpu.memory_space<vmem>>, vector<8x128xf32>
    %c0_1 = arith.constant 0 : index
    %c0_2 = arith.constant 0 : index
    %c0_3 = arith.constant 0 : index
    %1 = vector.load %arg2[%c0_1, %c0_2, %c0_3] : memref<2x128x128xf32, #tpu.memory_space<vmem>>, vector<1x128x128xf32>
    %2 = vector.shape_cast %1 : vector<1x128x128xf32> to vector<128x128xf32>
    %cst = arith.constant dense<0.000000e+00> : vector<8x128xf32>
    %3 = tpu.matmul %0, %2, %cst {dimension_numbers = #tpu.dot_dimension_numbers<[1], [0], [0], [1], [0, 0, 1, 1], [], []>} : vector<8x128xf32>, vector<128x128xf32>, vector<8x128xf32> -> vector<8x128xf32>
    %c0_4 = arith.constant 0 : index
    %c0_5 = arith.constant 0 : index
    %c0_6 = arith.constant 0 : index
    %4 = vector.load %arg3[%c0_4, %c0_5, %c0_6] : memref<2x1x128xf32, #tpu.memory_space<vmem>>, vector<1x1x128xf32>
    %5 = vector.shape_cast %4 : vector<1x1x128xf32> to vector<1x128xf32>
    %6 = vector.broadcast %5 : vector<1x128xf32> to vector<8x128xf32>
    %7 = arith.addf %3, %6 : vector<8x128xf32>
    %cst_7 = arith.constant 0.000000e+00 : f32
    %8 = vector.broadcast %cst_7 : f32 to vector<8x128xf32>
    %9 = arith.maximumf %7, %8 : vector<8x128xf32>
    %c1 = arith.constant 1 : index
    %c0_8 = arith.constant 0 : index
    %c0_9 = arith.constant 0 : index
    %10 = vector.load %arg2[%c1, %c0_8, %c0_9] : memref<2x128x128xf32, #tpu.memory_space<vmem>>, vector<1x128x128xf32>
    %11 = vector.shape_cast %10 : vector<1x128x128xf32> to vector<128x128xf32>
    %cst_10 = arith.constant dense<0.000000e+00> : vector<8x128xf32>
    %12 = tpu.matmul %9, %11, %cst_10 {dimension_numbers = #tpu.dot_dimension_numbers<[1], [0], [0], [1], [0, 0, 1, 1], [], []>} : vector<8x128xf32>, vector<128x128xf32>, vector<8x128xf32> -> vector<8x128xf32>
    %c1_11 = arith.constant 1 : index
    %c0_12 = arith.constant 0 : index
    %c0_13 = arith.constant 0 : index
    %13 = vector.load %arg3[%c1_11, %c0_12, %c0_13] : memref<2x1x128xf32, #tpu.memory_space<vmem>>, vector<1x1x128xf32>
    %14 = vector.shape_cast %13 : vector<1x1x128xf32> to vector<1x128xf32>
    %15 = vector.broadcast %14 : vector<1x128xf32> to vector<8x128xf32>
    %16 = arith.addf %12, %15 : vector<8x128xf32>
    %cst_14 = arith.constant 0.000000e+00 : f32
    %17 = vector.broadcast %cst_14 : f32 to vector<8x128xf32>
    %18 = arith.maximumf %16, %17 : vector<8x128xf32>
    %c0_15 = arith.constant 0 : index
    %c0_16 = arith.constant 0 : index
    %19 = vector.load %arg4[%c0_15, %c0_16] : memref<128x128xf32, #tpu.memory_space<vmem>>, vector<128x128xf32>
    %cst_17 = arith.constant dense<0.000000e+00> : vector<8x128xf32>
    %20 = tpu.matmul %18, %19, %cst_17 {dimension_numbers = #tpu.dot_dimension_numbers<[1], [0], [0], [1], [0, 0, 1, 1], [], []>} : vector<8x128xf32>, vector<128x128xf32>, vector<8x128xf32> -> vector<8x128xf32>
    %c0_18 = arith.constant 0 : index
    %c0_19 = arith.constant 0 : index
    %21 = vector.load %arg5[%c0_18, %c0_19] : memref<1x128xf32, #tpu.memory_space<vmem>>, vector<1x128xf32>
    %22 = vector.broadcast %21 : vector<1x128xf32> to vector<8x128xf32>
    %23 = arith.addf %20, %22 : vector<8x128xf32>
    %c0_20 = arith.constant 0 : index
    %c0_21 = arith.constant 0 : index
    %24 = vector.load %arg6[%c0_20, %c0_21] : memref<8x128xf32, #tpu.memory_space<vmem>>, vector<8x128xf32>
    tpu.vector_store %arg6[%c0_20, %c0_21], %23 {strides = array<i32>} : memref<8x128xf32, #tpu.memory_space<vmem>>, vector<8x128xf32>,
    return
  }
  func.func @transform_0(%arg0: i32) -> (i32, i32) {
    %c0_i32 = arith.constant 0 : i32
    %c0_i32_0 = arith.constant 0 : i32
    return %arg0, %c0_i32 : i32, i32
  }
  func.func @transform_1(%arg0: i32) -> (i32, i32, i32) {
    %c0_i32 = arith.constant 0 : i32
    %c0_i32_0 = arith.constant 0 : i32
    %c0_i32_1 = arith.constant 0 : i32
    %c0_i32_2 = arith.constant 0 : i32
    return %c0_i32, %c0_i32_0, %c0_i32_1 : i32, i32, i32
  }
  func.func @transform_2(%arg0: i32) -> (i32, i32, i32) {
    %c0_i32 = arith.constant 0 : i32
    %c0_i32_0 = arith.constant 0 : i32
    %c0_i32_1 = arith.constant 0 : i32
    %c0_i32_2 = arith.constant 0 : i32
    return %c0_i32, %c0_i32_0, %c0_i32_1 : i32, i32, i32
  }
  func.func @transform_3(%arg0: i32) -> (i32, i32) {
    %c0_i32 = arith.constant 0 : i32
    %c0_i32_0 = arith.constant 0 : i32
    %c0_i32_1 = arith.constant 0 : i32
    return %c0_i32, %c0_i32_0 : i32, i32
  }
  func.func @transform_4(%arg0: i32) -> (i32, i32) {
    %c0_i32 = arith.constant 0 : i32
    %c0_i32_0 = arith.constant 0 : i32
    %c0_i32_1 = arith.constant 0 : i32
    return %c0_i32, %c0_i32_0 : i32, i32
  }
  func.func @transform_5(%arg0: i32) -> (i32, i32) {
    %c0_i32 = arith.constant 0 : i32
    %c0_i32_0 = arith.constant 0 : i32
    return %arg0, %c0_i32 : i32, i32
  }
}

</mosaic_0001>

<bundles_post_ra>
// kernel: tpu_custom_call.1
= control target key start
LH: loop header
LB: loop body
LE: loop exit
PB: predicated region body
PF: predicated region fallthrough
CT: control target
= control target key end

     0   :  { %10 = vsyncpa [#allocation3], 0  ;;  %s828_s0 = inlined_call_operand.hbm [shape: f32[8,128], index: 0, kind: input, shape index: {}]   ;;  %s829_s1 = inlined_call_operand.hbm [shape: f32[2,128,128], index: 1, kind: input, shape index: {}]   ;;  %s830_s2 = inlined_call_operand.vmem [shape: f32[2,1,128], index: 2, kind: input, shape index: {}]   ;;  %s831_s3 = inlined_call_operand.hbm [shape: f32[128,128], index: 3, kind: input, shape index: {}]   ;;  %s832_s4 = inlined_call_operand.vmem [shape: f32[1,128], index: 4, kind: input, shape index: {}]   ;;  %s833_s5 = inlined_call_operand.hbm [shape: f32[8,128], index: 5, kind: output, shape index: {}]  }
   0x1   :  { %11 = vsyncpa [#allocation6], 0 }
   0x2   :  { %12 = vsyncpa [#allocation4], 0  ;;  %s696_s18 = smov [#allocation5]   ;;  %s602_s22 = scalar_lea.hbm %s829_s1, 4096 }
   0x3   :  { %s28_s19 = sshll.u32 %s696_s18, 4  ;;  %p603_p0 = scmp.ne.s32.totalorder %s829_s1, %s602_s22  ;;  %s29_s19 = int_to_ptr.vmem [resolvable:$true] %s28_s19 }
   0x4   :  { %p606_p1 = scmp.lt.u32.totalorder %s602_s22, %s829_s1 }
   0x6   :  { %p608_p2 = pnand %p606_p1, %p603_p0 }
   0x8   :  { %611 = shalt.err (!%p608_p2)
}
   0x9   :  { %s612_s27 = scalar_lea.vmem %s29_s19, 4096  ;;  %p617_p4 = scmp.lt.s32.totalorder %s29_s19, %s29_s19 }
   0xa   :  { %p613_p3 = scmp.ne.s32.totalorder %s29_s19, %s612_s27  ;;  %p618_p5 = scmp.lt.s32.totalorder %s612_s27, %s612_s27 }
   0xc   :  { %p619_p6 = por %p618_p5, %p617_p4 }
   0xe   :  { %p620_p7 = pnand %p619_p6, %p613_p3 }
  0x10   :  { %623 = shalt.err (!%p620_p7)
}
  0x11   :  { %s697_s28 = smov 128   ;;  %s698_s29 = smov 8  }
  0x12   :  { %34 = dma.hbm_to_vmem [thread:$0]  %s829_s1, 4096, %s29_s19, [#allocation6], %s697_s28, %s697_s28, %s698_s29  }
  0x13   :  { %s699_s7 = smov [#allocation2]   ;;  %s700_s9 = smov [#allocation7]  }
  0x14   :  { %s19_s8 = sshll.u32 %s699_s7, 4  ;;  %s42_s10 = sshll.u32 %s700_s9, 4  ;;  %s20_s8 = int_to_ptr.vmem [resolvable:$true] %s19_s8  ;;  %s43_s10 = int_to_ptr.vmem [resolvable:$true] %s42_s10 }
  0x15   :  { %s624_s13 = scalar_lea.hbm %s828_s0, 128 }
  0x16   :  { %p625_p8 = scmp.ne.s32.totalorder %s828_s0, %s624_s13  ;;  %p628_p9 = scmp.lt.u32.totalorder %s624_s13, %s828_s0 }
  0x18   :  { %p630_p10 = pnand %p628_p9, %p625_p8 }
  0x1a   :  { %633 = shalt.err (!%p630_p10)
}
  0x1b   :  { %s634_s1 = scalar_lea.vmem %s20_s8, 128  ;;  %p639_p12 = scmp.lt.s32.totalorder %s20_s8, %s20_s8 }
  0x1c   :  { %p635_p11 = scmp.ne.s32.totalorder %s20_s8, %s634_s1  ;;  %p640_p13 = scmp.lt.s32.totalorder %s634_s1, %s634_s1 }
  0x1e   :  { %p641_p0 = por %p640_p13, %p639_p12 }
  0x20   :  { %p642_p1 = pnand %p641_p0, %p635_p11 }
  0x22   :  { %645 = shalt.err (!%p642_p1)
}
  0x23   :  { %22 = dma.hbm_to_vmem [thread:$0]  %s828_s0, 128, %s20_s8, [#allocation3]  }
  0x24   :  { %s646_s22 = scalar_lea.hbm %s831_s3, 2048 }
  0x25   :  { %p647_p2 = scmp.ne.s32.totalorder %s831_s3, %s646_s22  ;;  %p650_p3 = scmp.lt.u32.totalorder %s646_s22, %s831_s3 }
  0x27   :  { %p652_p4 = pnand %p650_p3, %p647_p2 }
  0x29   :  { %655 = shalt.err (!%p652_p4)
}
  0x2a   :  { %s656_s27 = scalar_lea.vmem %s43_s10, 2048  ;;  %p661_p6 = scmp.lt.s32.totalorder %s43_s10, %s43_s10 }
  0x2b   :  { %p657_p5 = scmp.ne.s32.totalorder %s43_s10, %s656_s27  ;;  %p662_p7 = scmp.lt.s32.totalorder %s656_s27, %s656_s27 }
  0x2d   :  { %p663_p8 = por %p662_p7, %p661_p6 }
  0x2f   :  { %p664_p9 = pnand %p663_p8, %p657_p5 }
  0x31   :  { %667 = shalt.err (!%p664_p9)
}
  0x32   :  { %48 = dma.hbm_to_vmem [thread:$0]  %s831_s3, 2048, %s43_s10, [#allocation6], %s697_s28, %s697_s28, %s698_s29  }
  0x33   :  { %690 = dma.done.wait [#allocation3], 128  }
  0x34   :  { %691 = vsyncadd [#allocation3], 4294967168 }
  0x35   :  { %692 = dma.done.wait [#allocation6], 6144  }
  0x36   :  { %693 = vsyncadd [#allocation6], 4294961152  ;;  %v701_v0 = vmov 0.0|0.0   ;;  %vm702_vm0 = vmmov 0   ;;  %v703_v1 = vmov 0.0   ;;  %v61_v2 = vld [vmem:[#allocation5] sm:$0xff] }
  0x37   :  { %521 = vmatprep.subr.bf16.mxu0 %v701_v0  ;;  %448 = vmatprep.mubr.msk.f32.mxu0 %vm702_vm0, %v703_v1  ;;  %v62_v3 = vld [vmem:[#allocation5 + $0x8] sm:$0xff]  ;;  %v63_v4 = vld [vmem:[#allocation5 + $0x10] sm:$0xff]  ;;  %v64_v6 = vld [vmem:[#allocation5 + $0x18] sm:$0xff]  ;;  %s704_s9 = smov [#allocation8]  }
  0x38   :  { %545 = vmatprep.subr.bf16.mxu1 %v701_v0  ;;  %483 = vmatprep.mubr.msk.f32.mxu1 %vm702_vm0, %v703_v1  ;;  %v522_v5 = vpack.c.bf16 %v62_v3, %v61_v2  ;;  %v525_v7 = vpack.c.bf16 %v64_v6, %v63_v4  ;;  %v65_v8 = vld [vmem:[#allocation5 + $0x20] sm:$0xff]  ;;  %v66_v9 = vld [vmem:[#allocation5 + $0x28] sm:$0xff]  ;;  %v158_v12 = vld [vmem:[#allocation5 + $0x90] sm:$0xff]  ;;  %s351_s10 = sshll.u32 %s704_s9, 4  ;;  %s352_s10 = int_to_ptr.vmem [resolvable:$true] %s351_s10 }
  0x39   :  { %v156_v10 = vld [vmem:[#allocation5 + $0x80] sm:$0xff]  ;;  %v157_v11 = vld [vmem:[#allocation5 + $0x88] sm:$0xff]  ;;  %v159_v13 = vld [vmem:[#allocation5 + $0x98] sm:$0xff]  ;;  %v528_v14 = vpack.c.bf16 %v66_v9, %v65_v8  ;;  %s668_s11 = scalar_lea.vmem %s352_s10, 128  ;;  %p673_p11 = scmp.lt.s32.totalorder %s352_s10, %s352_s10 }
  0x3a   :  { %523 = vmatpush3.bf16.msra.mxu0 %v522_v5  ;;  %v546_v15 = vpack.c.bf16 %v157_v11, %v156_v10  ;;  %v67_v16 = vld [vmem:[#allocation5 + $0x30] sm:$0xff]  ;;  %v68_v17 = vld [vmem:[#allocation5 + $0x38] sm:$0xff]  ;;  %v549_v18 = vpack.c.bf16 %v159_v13, %v158_v12  ;;  %v160_v19 = vld [vmem:[#allocation5 + $0xa0] sm:$0xff]  ;;  %p669_p10 = scmp.ne.s32.totalorder %s352_s10, %s668_s11  ;;  %p674_p12 = scmp.lt.s32.totalorder %s668_s11, %s668_s11 }
  0x3b   :  { %524 = vmatprep.subr.bf16.mxu0 %v701_v0  ;;  %v161_v20 = vld [vmem:[#allocation5 + $0xa8] sm:$0xff]  ;;  %v531_v21 = vpack.c.bf16 %v68_v17, %v67_v16  ;;  %v69_v22 = vld [vmem:[#allocation5 + $0x40] sm:$0xff]  ;;  %v162_v25 = vld [vmem:[#allocation5 + $0xb0] sm:$0xff] }
  0x3c   :  { %547 = vmatpush3.bf16.msra.mxu1 %v546_v15  ;;  %v70_v23 = vld [vmem:[#allocation5 + $0x48] sm:$0xff]  ;;  %v552_v24 = vpack.c.bf16 %v161_v20, %v160_v19  ;;  %v163_v26 = vld [vmem:[#allocation5 + $0xb8] sm:$0xff]  ;;  %v71_v28 = vld [vmem:[#allocation5 + $0x50] sm:$0xff]  ;;  %p675_p13 = por %p674_p12, %p673_p11 }
  0x3d   :  { %548 = vmatprep.subr.bf16.mxu1 %v701_v0  ;;  %v534_v27 = vpack.c.bf16 %v70_v23, %v69_v22  ;;  %v72_v29 = vld [vmem:[#allocation5 + $0x58] sm:$0xff]  ;;  %v555_v30 = vpack.c.bf16 %v163_v26, %v162_v25  ;;  %v164_v31 = vld [vmem:[#allocation5 + $0xc0] sm:$0xff]  ;;  %v165_v32 = vld [vmem:[#allocation5 + $0xc8] sm:$0xff] }
  0x3e   :  { %526 = vmatpush3.bf16.msra.mxu0 %v525_v7  ;;  %v537_v33 = vpack.c.bf16 %v72_v29, %v71_v28  ;;  %v73_v34 = vld [vmem:[#allocation5 + $0x60] sm:$0xff]  ;;  %v74_v35 = vld [vmem:[#allocation5 + $0x68] sm:$0xff]  ;;  %v558_v36 = vpack.c.bf16 %v165_v32, %v164_v31  ;;  %v166_v37 = vld [vmem:[#allocation5 + $0xd0] sm:$0xff]  ;;  %p676_p0 = pnand %p675_p13, %p669_p10 }
  0x3f   :  { %527 = vmatprep.subr.bf16.mxu0 %v701_v0  ;;  %v167_v38 = vld [vmem:[#allocation5 + $0xd8] sm:$0xff]  ;;  %v540_v39 = vpack.c.bf16 %v74_v35, %v73_v34  ;;  %v75_v40 = vld [vmem:[#allocation5 + $0x70] sm:$0xff]  ;;  %v168_v43 = vld [vmem:[#allocation5 + $0xe0] sm:$0xff] }
  0x40   :  { %550 = vmatpush3.bf16.msra.mxu1 %v549_v18  ;;  %v76_v41 = vld [vmem:[#allocation5 + $0x78] sm:$0xff]  ;;  %v561_v42 = vpack.c.bf16 %v167_v38, %v166_v37  ;;  %v169_v44 = vld [vmem:[#allocation5 + $0xe8] sm:$0xff]  ;;  %v170_v48 = vld [vmem:[#allocation5 + $0xf0] sm:$0xff] }
  0x41   :  { %551 = vmatprep.subr.bf16.mxu1 %v701_v0  ;;  %v543_v45 = vpack.c.bf16 %v76_v41, %v75_v40  ;;  %v564_v46 = vpack.c.bf16 %v169_v44, %v168_v43  ;;  %v60_v47 = vld [vmem:[#allocation2] sm:$0xff]  ;;  %v251_v51 = vld [vmem:[#allocation7] sm:$0xff]  ;;  %v252_v52 = vld [vmem:[#allocation7 + $0x8] sm:$0xff] }
  0x42   :  { %529 = vmatpush3.bf16.msra.mxu0 %v528_v14  ;;  %v171_v49 = vld [vmem:[#allocation5 + $0xf8] sm:$0xff]  ;;  %v253_v53 = vld [vmem:[#allocation7 + $0x10] sm:$0xff]  ;;  %v570_v54 = vpack.c.bf16 %v252_v52, %v251_v51  ;;  %v255_v57 = vld [vmem:[#allocation7 + $0x20] sm:$0xff] }
  0x43   :  { %530 = vmatprep.subr.bf16.mxu0 %v701_v0  ;;  %v567_v50 = vpack.c.bf16 %v171_v49, %v170_v48  ;;  %v254_v55 = vld [vmem:[#allocation7 + $0x18] sm:$0xff]  ;;  %v256_v58 = vld [vmem:[#allocation7 + $0x28] sm:$0xff]  ;;  %v257_v60 = vld [vmem:[#allocation7 + $0x30] sm:$0xff] }
  0x44   :  { %553 = vmatpush3.bf16.msra.mxu1 %v552_v24  ;;  %v573_v56 = vpack.c.bf16 %v254_v55, %v253_v53  ;;  %v576_v59 = vpack.c.bf16 %v256_v58, %v255_v57  ;;  %v258_v61 = vld [vmem:[#allocation7 + $0x38] sm:$0xff]  ;;  %v259_v63 = vld [vmem:[#allocation7 + $0x40] sm:$0xff]  ;;  %v261_v3 = vld [vmem:[#allocation7 + $0x50] sm:$0xff] }
  0x45   :  { %554 = vmatprep.subr.bf16.mxu1 %v701_v0  ;;  %v579_v62 = vpack.c.bf16 %v258_v61, %v257_v60  ;;  %v262_v4 = vld [vmem:[#allocation7 + $0x58] sm:$0xff]  ;;  %v263_v6 = vld [vmem:[#allocation7 + $0x60] sm:$0xff]  ;;  %v264_v7 = vld [vmem:[#allocation7 + $0x68] sm:$0xff] }
  0x46   :  { %532 = vmatpush3.bf16.msra.mxu0 %v531_v21  ;;  %v585_v5 = vpack.c.bf16 %v262_v4, %v261_v3  ;;  %v588_v8 = vpack.c.bf16 %v264_v7, %v263_v6  ;;  %v361_v9 = vld [vmem:[%s830_s2] ss:$0 sm:$0xff]  ;;  %v265_v14 = vld [vmem:[#allocation7 + $0x70] sm:$0xff]  ;;  %v363_v17 = vld [vmem:[%s830_s2 + $0x1] ss:$0 sm:$0xff] }
  0x47   :  { %533 = vmatprep.subr.bf16.mxu0 %v701_v0  ;;  %v266_v15 = vld [vmem:[#allocation7 + $0x78] sm:$0xff] }
  0x48   :  { %556 = vmatpush3.bf16.msra.mxu1 %v555_v30  ;;  %v591_v16 = vpack.c.bf16 %v266_v15, %v265_v14  ;;  %v364_v21 = vld [vmem:[%s832_s4] ss:$0 sm:$0xff] }
  0x49   :  { %557 = vmatprep.subr.bf16.mxu1 %v701_v0 }
  0x4a   :  { %535 = vmatpush3.bf16.msra.mxu0 %v534_v27 }
  0x4b   :  { %536 = vmatprep.subr.bf16.mxu0 %v701_v0 }
  0x4c   :  { %559 = vmatpush3.bf16.msra.mxu1 %v558_v36 }
  0x4d   :  { %560 = vmatprep.subr.bf16.mxu1 %v701_v0 }
  0x4e   :  { %538 = vmatpush3.bf16.msra.mxu0 %v537_v33 }
  0x4f   :  { %539 = vmatprep.subr.bf16.mxu0 %v701_v0 }
  0x50   :  { %562 = vmatpush3.bf16.msra.mxu1 %v561_v42 }
  0x51   :  { %563 = vmatprep.subr.bf16.mxu1 %v701_v0 }
  0x52   :  { %541 = vmatpush3.bf16.msra.mxu0 %v540_v39 }
  0x53   :  { %542 = vmatprep.subr.bf16.mxu0 %v701_v0 }
  0x54   :  { %565 = vmatpush3.bf16.msra.mxu1 %v564_v46 }
  0x55   :  { %566 = vmatprep.subr.bf16.mxu1 %v701_v0 }
  0x56   :  { %544 = vmatpush3.bf16.msra.mxu0 %v543_v45 }
  0x57   :  { %569 = vmatprep.subr.bf16.mxu0 %v701_v0 }
  0x58   :  { %568 = vmatpush3.bf16.msra.mxu1 %v567_v50 }
  0x59   :  { %449 = vmatmul.mubr.f32.vlgmr.msra.gmra.mrb[0].mxu0 %v60_v47 }
  0x5a   :  { %518 = vmatprep.mubr.msk.f32.mxu0 %vm702_vm0, %v703_v1  ;;  %571 = vmatpush3.bf16.msra.mxu0 %v570_v54  ;;  %v260_v1 = vld [vmem:[#allocation7 + $0x48] sm:$0xff] }
  0x5b   :  { %572 = vmatprep.subr.bf16.mxu0 %v701_v0  ;;  %v582_v2 = vpack.c.bf16 %v260_v1, %v259_v63 }
  0x5e   :  { %574 = vmatpush3.bf16.msra.mxu0 %v573_v56 }
  0x5f   :  { %575 = vmatprep.subr.bf16.mxu0 %v701_v0 }
  0x62   :  { %577 = vmatpush3.bf16.msra.mxu0 %v576_v59 }
  0x63   :  { %578 = vmatprep.subr.bf16.mxu0 %v701_v0 }
  0x66   :  { %580 = vmatpush3.bf16.msra.mxu0 %v579_v62 }
  0x67   :  { %581 = vmatprep.subr.bf16.mxu0 %v701_v0 }
  0x6a   :  { %583 = vmatpush3.bf16.msra.mxu0 %v582_v2 }
  0x6b   :  { %584 = vmatprep.subr.bf16.mxu0 %v701_v0 }
  0x6e   :  { %586 = vmatpush3.bf16.msra.mxu0 %v585_v5 }
  0x6f   :  { %587 = vmatprep.subr.bf16.mxu0 %v701_v0 }
  0x72   :  { %589 = vmatpush3.bf16.msra.mxu0 %v588_v8 }
  0x73   :  { %590 = vmatprep.subr.bf16.mxu0 %v701_v0 }
  0x76   :  { %592 = vmatpush3.bf16.msra.mxu0 %v591_v16 }
 0x12c   :  { %v150_v10 = vpop.f32.mrb[0].mxu0 }
 0x12d   :  { %v151_v11 = vadd.f32 %v361_v9, %v150_v10  ;;  %v450_v12 = vpop.f32.mrb[1].mxu0 }
 0x12f   :  { %v154_v13 = vmax.f32 %v151_v11, 0.0 }
 0x131   :  { %484 = vmatmul.mubr.f32.vlgmr.msra.gmra.mrb[0].mxu1 %v154_v13 }
 0x204   :  { %v246_v18 = vpop.f32.mrb[0].mxu1 }
 0x205   :  { %v247_v19 = vadd.f32 %v363_v17, %v246_v18  ;;  %v485_v0 = vpop.f32.mrb[1].mxu1 }
 0x207   :  { %v250_v20 = vmax.f32 %v247_v19, 0.0 }
 0x209   :  { %519 = vmatmul.mubr.f32.vlgmr.msra.gmra.mrb[2].mxu0 %v250_v20 }
 0x2dc   :  { %v340_v22 = vpop.f32.mrb[2].mxu0 }
 0x2dd   :  { %v341_v23 = vadd.f32 %v364_v21, %v340_v22  ;;  %v520_v24 = vpop.f32.mrb[3].mxu0 }
 0x2df   :  { %344 = vst [vmem:[#allocation8] sm:$0xff] %v341_v23 }
 0x2e0   :  { %679 = shalt.err (!%p676_p0)
}
 0x2e1   :  { %s680_s13 = scalar_lea.hbm %s833_s5, 128 }
 0x2e2   :  { %p681_p1 = scmp.ne.s32.totalorder %s833_s5, %s680_s13  ;;  %p684_p2 = scmp.lt.u32.totalorder %s680_s13, %s833_s5 }
 0x2e4   :  { %p686_p3 = pnand %p684_p2, %p681_p1 }
 0x2e6   :  { %689 = shalt.err (!%p686_p3)
}
 0x2e7   :  { %354 = dma.vmem_to_hbm [thread:$0]  %s352_s10, 128, %s833_s5, [#allocation4]  }
 0x2e8   :  { %694 = dma.done.wait [#allocation4], 128  }
 0x2e9   :  { %695 = vsyncadd [#allocation4], 4294967168 }
 0x2ea   :  { %358 = vsyncpa [#allocation3], 1 }
 0x2eb   :  { %359 = vsyncpa [#allocation6], 1 }
 0x2ec   :  { %360 = vsyncpa [#allocation4], 1 }

</bundles_post_ra>
